<compile_context>
chip_gen: v7x
topology: tpu7x:2x2x1
jax: 0.10.0
libtpu: 0.0.40
codegen_flags: <defaults>
</compile_context>

<pallas_src>
import jax
import jax.numpy as jnp
from jax.experimental import pallas as pl
from jax.experimental.pallas import tpu as pltpu

LANE = 128


def _round_up(x, m):
    return ((x + m - 1) // m) * m


def mlp_kernel(x_ref, w1_ref, b1_ref, w2_ref, b2_ref, o_ref):
    # Cast the f32 activation tile to bf16 in VMEM (no extra HBM pass).
    x = x_ref[...].astype(jnp.bfloat16)                       # (TB, F_in)
    # First linear layer: bf16 MXU matmul, f32 accumulation.
    h = jnp.dot(x, w1_ref[...], preferred_element_type=jnp.float32)
    # Bias + ReLU in f32 on the VPU (bias is a resident (1, H_p) block).
    h = jnp.maximum(h + b1_ref[...], 0.0)
    # Second linear layer: cast activations to bf16 for the MXU, accumulate f32.
    o = jnp.dot(h.astype(w2_ref.dtype), w2_ref[...],
                preferred_element_type=jnp.float32)
    o_ref[...] = (o + b2_ref[...]).astype(o_ref.dtype)


def mlp_feature_encoder(x, w1, b1, w2, b2, *, tb=512):
    """x: [B, F_in]; w1: [F_in, H]; b1: [H] or [1, H]; w2: [H, F_out]; b2: [F_out] or [1, F_out]."""
    B, F_in = x.shape
    H = w1.shape[1]
    F_out = w2.shape[1]
    out_dtype = x.dtype

    # Pad only the hidden dim (weights/biases are tiny, one-time) so the
    # intermediate activation is lane-dense.  Zero-padded w1 columns / b1
    # entries give exactly-zero padded hidden lanes, which then hit zero rows
    # of w2 -> no effect on the result.
    H_p = _round_up(H, LANE)
    w1_p = jnp.zeros((F_in, H_p), jnp.bfloat16).at[:, :H].set(w1.astype(jnp.bfloat16))
    b1_p = jnp.zeros((1, H_p), jnp.float32).at[:, :H].set(
        b1.reshape(1, H).astype(jnp.float32))
    w2_p = jnp.zeros((H_p, F_out), jnp.bfloat16).at[:H, :].set(w2.astype(jnp.bfloat16))
    b2_p = b2.reshape(1, F_out).astype(jnp.float32)

    # Batch tile: multiple of 16 (bf16 sublane packing), capped so the grid has
    # >= ~4 steps when B allows it (pipelining + v7x two-TC sharding).
    tb = max(16, min(tb, _round_up(pl.cdiv(B, 4), 16)))
    grid = (pl.cdiv(B, tb),)   # ragged final block handled by Pallas masking

    # VMEM: double-buffered f32 x tile + f32 out tile + resident weights; for
    # tb<=2048 at these feature widths this is well under 32 MiB (safe on v7x).
    out = pl.pallas_call(
        mlp_kernel,
        out_shape=jax.ShapeDtypeStruct((B, F_out), out_dtype),
        grid_spec=pltpu.PrefetchScalarGridSpec(
            num_scalar_prefetch=0,
            grid=grid,
            in_specs=[
                # Activations: tiled over batch, pipelined/double-buffered,
                # unpadded lanes (F_in equals the full array dim).
                pl.BlockSpec((tb, F_in), lambda i: (i, 0)),
                # Weights + biases: constant index -> resident, no re-DMA per step.
                pl.BlockSpec((F_in, H_p), lambda i: (0, 0)),
                pl.BlockSpec((1, H_p), lambda i: (0, 0)),
                pl.BlockSpec((H_p, F_out), lambda i: (0, 0)),
                pl.BlockSpec((1, F_out), lambda i: (0, 0)),
            ],
            out_specs=pl.BlockSpec((tb, F_out), lambda i: (i, 0)),
        ),
        compiler_params=pltpu.CompilerParams(
            dimension_semantics=("parallel",),   # batch rows independent
            vmem_limit_bytes=32 << 20,
        ),
    )(x, w1_p, b1_p, w2_p, b2_p)
    return out


if __name__ == "__main__":
    # Module hyperparameters (small, consistent with the forward pass).
    num_in_features = 32
    hidden_units = 64
    num_out_features = 16
    batch = 512                      # several batch tiles so the grid pipelines

    key = jax.random.PRNGKey(0)
    kx, k1, kb1, k2, kb2 = jax.random.split(key, 5)

    # Deterministic synthetic parameters (PyTorch Linear: W [out, in], b [out];
    # kept pre-transposed as [in, out] for the kernel).
    x = jax.random.normal(kx, (batch, num_in_features), dtype=jnp.float32)
    w1 = jax.random.normal(k1, (num_in_features, hidden_units), dtype=jnp.float32) * 0.1
    b1 = jax.random.normal(kb1, (hidden_units,), dtype=jnp.float32) * 0.1
    w2 = jax.random.normal(k2, (hidden_units, num_out_features), dtype=jnp.float32) * 0.1
    b2 = jax.random.normal(kb2, (num_out_features,), dtype=jnp.float32) * 0.1

    out = mlp_feature_encoder(x, w1, b1, w2, b2)
    out = jax.block_until_ready(out)
    assert out.shape == (batch, num_out_features)
    assert out.dtype == x.dtype

    # Reference with matching precision (bf16 matmuls, f32 accumulation/epilogue).
    xb, w1b, w2b = (a.astype(jnp.bfloat16) for a in (x, w1, w2))
    h_ref = jnp.maximum(
        jnp.dot(xb, w1b, preferred_element_type=jnp.float32) + b1[None, :], 0.0)
    ref = jnp.dot(h_ref.astype(jnp.bfloat16), w2b,
                  preferred_element_type=jnp.float32) + b2[None, :]
    assert jnp.allclose(out, ref, atol=2e-2, rtol=2e-2)

    # Sanity vs. full-f32 reference (looser: bf16 weight/activation rounding).
    ref_f32 = jnp.maximum(x @ w1 + b1[None, :], 0.0) @ w2 + b2[None, :]
    assert jnp.allclose(out, ref_f32, atol=5e-2, rtol=5e-2)

    print("KERNEL_OK")
</pallas_src>

<mosaic_0001>
module attributes {stable_mosaic.version = 11 : i64} {
  func.func @mlp_kernel(%arg0: i32, %arg1: memref<128x32xf32, #tpu.memory_space<vmem>>, %arg2: memref<32x128xbf16, #tpu.memory_space<vmem>>, %arg3: memref<1x128xf32, #tpu.memory_space<vmem>>, %arg4: memref<128x16xbf16, #tpu.memory_space<vmem>>, %arg5: memref<1x16xf32, #tpu.memory_space<vmem>>, %arg6: memref<128x16xf32, #tpu.memory_space<vmem>>) attributes {dimension_semantics = [#tpu.dimension_semantics<parallel>], iteration_bounds = array<i64: 4>, scalar_prefetch = 0 : i64, scratch_operands = 0 : i64, tpu.core_type = #tpu.core_type<tc>, window_params = [{transform_indices = @transform_0, window_bounds = array<i64: 128, 32>}, {pipeline_mode = #tpu.pipeline_mode<synchronous>, transform_indices = @transform_1, window_bounds = array<i64: 32, 128>}, {pipeline_mode = #tpu.pipeline_mode<synchronous>, transform_indices = @transform_2, window_bounds = array<i64: 1, 128>}, {pipeline_mode = #tpu.pipeline_mode<synchronous>, transform_indices = @transform_3, window_bounds = array<i64: 128, 16>}, {pipeline_mode = #tpu.pipeline_mode<synchronous>, transform_indices = @transform_4, window_bounds = array<i64: 1, 16>}, {transform_indices = @transform_5, window_bounds = array<i64: 128, 16>}]} {
    %c0 = arith.constant 0 : index
    %c0_0 = arith.constant 0 : index
    %0 = vector.load %arg1[%c0, %c0_0] : memref<128x32xf32, #tpu.memory_space<vmem>>, vector<128x32xf32>
    %1 = arith.truncf %0 : vector<128x32xf32> to vector<128x32xbf16>
    %c0_1 = arith.constant 0 : index
    %c0_2 = arith.constant 0 : index
    %2 = vector.load %arg2[%c0_1, %c0_2] : memref<32x128xbf16, #tpu.memory_space<vmem>>, vector<32x128xbf16>
    %cst = arith.constant dense<0.000000e+00> : vector<128x128xf32>
    %3 = tpu.matmul %1, %2, %cst {dimension_numbers = #tpu.dot_dimension_numbers<[1], [0], [0], [1], [0, 0, 1, 1], [], []>} : vector<128x32xbf16>, vector<32x128xbf16>, vector<128x128xf32> -> vector<128x128xf32>
    %c0_3 = arith.constant 0 : index
    %c0_4 = arith.constant 0 : index
    %4 = vector.load %arg3[%c0_3, %c0_4] : memref<1x128xf32, #tpu.memory_space<vmem>>, vector<1x128xf32>
    %5 = vector.broadcast %4 : vector<1x128xf32> to vector<128x128xf32>
    %6 = arith.addf %3, %5 : vector<128x128xf32>
    %cst_5 = arith.constant 0.000000e+00 : f32
    %7 = vector.broadcast %cst_5 : f32 to vector<128x128xf32>
    %8 = arith.maximumf %6, %7 : vector<128x128xf32>
    %9 = arith.truncf %8 : vector<128x128xf32> to vector<128x128xbf16>
    %c0_6 = arith.constant 0 : index
    %c0_7 = arith.constant 0 : index
    %10 = vector.load %arg4[%c0_6, %c0_7] : memref<128x16xbf16, #tpu.memory_space<vmem>>, vector<128x16xbf16>
    %cst_8 = arith.constant dense<0.000000e+00> : vector<128x16xf32>
    %11 = tpu.matmul %9, %10, %cst_8 {dimension_numbers = #tpu.dot_dimension_numbers<[1], [0], [0], [1], [0, 0, 1, 1], [], []>} : vector<128x128xbf16>, vector<128x16xbf16>, vector<128x16xf32> -> vector<128x16xf32>
    %c0_9 = arith.constant 0 : index
    %c0_10 = arith.constant 0 : index
    %12 = vector.load %arg5[%c0_9, %c0_10] : memref<1x16xf32, #tpu.memory_space<vmem>>, vector<1x16xf32>
    %13 = vector.broadcast %12 : vector<1x16xf32> to vector<128x16xf32>
    %14 = arith.addf %11, %13 : vector<128x16xf32>
    %c0_11 = arith.constant 0 : index
    %c0_12 = arith.constant 0 : index
    %15 = vector.load %arg6[%c0_11, %c0_12] : memref<128x16xf32, #tpu.memory_space<vmem>>, vector<128x16xf32>
    tpu.vector_store %arg6[%c0_11, %c0_12], %14 {strides = array<i32>} : memref<128x16xf32, #tpu.memory_space<vmem>>, vector<128x16xf32>,
    return
  }
  func.func @transform_0(%arg0: i32) -> (i32, i32) {
    %c0_i32 = arith.constant 0 : i32
    %c0_i32_0 = arith.constant 0 : i32
    return %arg0, %c0_i32 : i32, i32
  }
  func.func @transform_1(%arg0: i32) -> (i32, i32) {
    %c0_i32 = arith.constant 0 : i32
    %c0_i32_0 = arith.constant 0 : i32
    %c0_i32_1 = arith.constant 0 : i32
    return %c0_i32, %c0_i32_0 : i32, i32
  }
  func.func @transform_2(%arg0: i32) -> (i32, i32) {
    %c0_i32 = arith.constant 0 : i32
    %c0_i32_0 = arith.constant 0 : i32
    %c0_i32_1 = arith.constant 0 : i32
    return %c0_i32, %c0_i32_0 : i32, i32
  }
  func.func @transform_3(%arg0: i32) -> (i32, i32) {
    %c0_i32 = arith.constant 0 : i32
    %c0_i32_0 = arith.constant 0 : i32
    %c0_i32_1 = arith.constant 0 : i32
    return %c0_i32, %c0_i32_0 : i32, i32
  }
  func.func @transform_4(%arg0: i32) -> (i32, i32) {
    %c0_i32 = arith.constant 0 : i32
    %c0_i32_0 = arith.constant 0 : i32
    %c0_i32_1 = arith.constant 0 : i32
    return %c0_i32, %c0_i32_0 : i32, i32
  }
  func.func @transform_5(%arg0: i32) -> (i32, i32) {
    %c0_i32 = arith.constant 0 : i32
    %c0_i32_0 = arith.constant 0 : i32
    return %arg0, %c0_i32 : i32, i32
  }
}

</mosaic_0001>

<bundles_post_ra>
// kernel: tpu_custom_call.1
= control target key start
LH: loop header
LB: loop body
LE: loop exit
PB: predicated region body
PF: predicated region fallthrough
CT: control target
= control target key end

     0   :  { %s844_s18 = smov 0   ;;  %s964_s0 = inlined_call_operand.vmem [shape: f32[512,32], index: 0, kind: input, shape index: {}]   ;;  %s965_s1 = inlined_call_operand.vmem [shape: bf16[32,128], index: 1, kind: input, shape index: {}]   ;;  %s966_s2 = inlined_call_operand.vmem [shape: f32[1,128], index: 2, kind: input, shape index: {}]   ;;  %s967_s3 = inlined_call_operand.vmem [shape: bf16[128,16], index: 3, kind: input, shape index: {}]   ;;  %s968_s4 = inlined_call_operand.vmem [shape: f32[1,16], index: 4, kind: input, shape index: {}]   ;;  %s969_s5 = inlined_call_operand.vmem [shape: f32[512,16], index: 5, kind: output, shape index: {}]  }
   0x1 LB: > { %s663_s19 = sadd.s32 4294967295, %s812_s18   ;;  %p667_p0 = scmp.ge.s32.totalorder %s812_s18, 1  ;;  %s812_s18 = sphi %s844_s18, %s15_s18  }
   0x2   : > { %p188_p1 = scmp.lt.s32.totalorder %s812_s18, 5 }
   0x4   : > { %p189_p2 = pnand %p667_p0, %p188_p1 }
   0x5   : > { %v796_v0 = vld [vmem:[%s965_s1] sm:$0xff] (!%p189_p2)   ;;  %s668_s22 = sshll.u32 (!%p189_p2), %s663_s19, 4  ;;  %v797_v1 = vld [vmem:[%s965_s1 + $0x8] sm:$0xff] (!%p189_p2)   ;;  %v800_v4 = vld [vmem:[%s967_s3 + $0x10] sm:$0xff] (!%p189_p2)   ;;  %vm276_vm0 = vcmask (!%p189_p2), 261120   ;;  %vm590_vm1 = vcmask (!%p189_p2), 130048  }
   0x6   : > { %192 = sbr.rel (%p189_p2) target bundleno = 484 (0x1e4), region = 40  ;;  %p217_p3 = scmp.lt.s32.totalorder (!%p189_p2), %s668_s22, 63  ;;  %720 = vmatprep.subr.bf16.mxu0 (!%p189_p2), %v796_v0  ;;  %v798_v2 = vld [vmem:[%s967_s3] sm:$0xff] (!%p189_p2)   ;;  %v799_v3 = vld [vmem:[%s967_s3 + $0x8] sm:$0xff] (!%p189_p2)   ;;  %v801_v16 = vld [vmem:[%s967_s3 + $0x18] sm:$0xff] (!%p189_p2)  }
   0x7   : > { %721 = vmatpush3.bf16.msra.mxu0 (!%p189_p2), %v796_v0  ;;  %772 = vmatprep.subr.bf16.mxu1 (!%p189_p2), %v798_v2  ;;  %v802_v21 = vld [vmem:[%s967_s3 + $0x20] sm:$0xff] (!%p189_p2)   ;;  %v803_v24 = vld [vmem:[%s967_s3 + $0x28] sm:$0xff] (!%p189_p2)   ;;  %v804_v32 = vld [vmem:[%s967_s3 + $0x30] sm:$0xff] (!%p189_p2)  }
   0x8   : > { %722 = vmatprep.subr.bf16.mxu0 (!%p189_p2), %v797_v1  ;;  %780 = vmatpush3.bf16.msra.mxu1 (!%p189_p2), %v798_v2  ;;  %v805_v33 = vld [vmem:[%s967_s3 + $0x38] sm:$0xff] (!%p189_p2)   ;;  %v672_v34 = vld [vmem:[%s966_s2] ss:$0 sm:$0xff] (!%p189_p2) }
   0x9   : > { %773 = vmatprep.subr.bf16.mxu1 (!%p189_p2), %v799_v3 }
   0xb   : > { %723 = vmatpush3.bf16.msra.mxu0 (!%p189_p2), %v797_v1 }
   0xc   : > { %740 = vmatprep.subr.bf16.mxu0 (!%p189_p2), %v798_v2  ;;  %781 = vmatpush3.bf16.msra.mxu1 (!%p189_p2), %v799_v3 }
   0xd   : > { %s971_s22 = smov (!%p217_p3, %s668_s22), 63  ;;  %774 = vmatprep.subr.bf16.mxu1 %v800_v4 }
   0xe   : > { %s669_s29 = sshll.u32 %s971_s22, 3 }
   0xf   : > { %s872_s7 = scalar_lea.vmem %s964_s0, %s669_s29  ;;  %s927_s28 = scalar_lea.vmem %s969_s5, %s669_s29 }
  0x10   : > { %v229_v5 = vld [vmem:[%s872_s7] sm:$0xff]  ;;  %v230_v6 = vld [vmem:[%s872_s7 + $0x8] sm:$0xff]  ;;  %v231_v7 = vld [vmem:[%s872_s7 + $0x10] sm:$0xff]  ;;  %782 = vmatpush3.bf16.msra.mxu1 %v800_v4 }
  0x11   : > { %v245_v8 = vpack.c.bf16 %v230_v6, %v229_v5  ;;  %v232_v9 = vld [vmem:[%s872_s7 + $0x18] sm:$0xff]  ;;  %v233_v10 = vld [vmem:[%s872_s7 + $0x20] sm:$0xff]  ;;  %v234_v11 = vld [vmem:[%s872_s7 + $0x28] sm:$0xff]  ;;  %775 = vmatprep.subr.bf16.mxu1 %v801_v16 }
  0x12   : > { %v246_v12 = vpack.c.bf16 %v232_v9, %v231_v7  ;;  %v247_v13 = vpack.c.bf16 %v234_v11, %v233_v10  ;;  %v235_v14 = vld [vmem:[%s872_s7 + $0x30] sm:$0xff]  ;;  %v236_v15 = vld [vmem:[%s872_s7 + $0x38] sm:$0xff]  ;;  %v237_v17 = vld [vmem:[%s872_s7 + $0x40] sm:$0xff] }
  0x13   : > { %724 = vmatprep.mubr.msk.bf16.mxu0 %vm276_vm0, %v245_v8  ;;  %v238_v18 = vld [vmem:[%s872_s7 + $0x48] sm:$0xff]  ;;  %v248_v19 = vpack.c.bf16 %v236_v15, %v235_v14  ;;  %v239_v22 = vld [vmem:[%s872_s7 + $0x50] sm:$0xff]  ;;  %v240_v23 = vld [vmem:[%s872_s7 + $0x58] sm:$0xff] }
  0x14   : > { %725 = vmatmul.mubr.msk.bf16.vlgmr.msra.gmra.mrb[0].mxu0 %vm276_vm0, %v246_v12  ;;  %v249_v20 = vpack.c.bf16 %v238_v18, %v237_v17  ;;  %783 = vmatpush3.bf16.msra.mxu1 %v801_v16  ;;  %v241_v25 = vld [vmem:[%s872_s7 + $0x60] sm:$0xff]  ;;  %v242_v26 = vld [vmem:[%s872_s7 + $0x68] sm:$0xff]  ;;  %v250_v27 = vpack.c.bf16 %v240_v23, %v239_v22  ;;  %v243_v29 = vld [vmem:[%s872_s7 + $0x70] sm:$0xff] }
  0x15   : > { %728 = vmatprep.mubr.msk.bf16.mxu0 %vm276_vm0, %v247_v13  ;;  %741 = vmatpush3.bf16.msra.mxu0 %v798_v2  ;;  %v251_v28 = vpack.c.bf16 %v242_v26, %v241_v25  ;;  %v244_v30 = vld [vmem:[%s872_s7 + $0x78] sm:$0xff] }
  0x16   : > { %742 = vmatprep.subr.bf16.mxu0 %v799_v3  ;;  %776 = vmatprep.subr.bf16.mxu1 %v802_v21  ;;  %v252_v31 = vpack.c.bf16 %v244_v30, %v243_v29 }
  0x18   : > { %784 = vmatpush3.bf16.msra.mxu1 %v802_v21 }
  0x19   : > { %743 = vmatpush3.bf16.msra.mxu0 %v799_v3  ;;  %777 = vmatprep.subr.bf16.mxu1 %v803_v24 }
  0x1a   : > { %744 = vmatprep.subr.bf16.mxu0 %v800_v4 }
  0x1c   : > { %729 = vmatmul.mubr.msk.bf16.gmra.mrb[4].mxu0 %vm276_vm0, %v248_v19  ;;  %785 = vmatpush3.bf16.msra.mxu1 %v803_v24 }
  0x1d   : > { %732 = vmatprep.mubr.msk.bf16.mxu0 %vm276_vm0, %v249_v20  ;;  %745 = vmatpush3.bf16.msra.mxu0 %v800_v4 }
  0x1e   : > { %746 = vmatprep.subr.bf16.mxu0 %v801_v16  ;;  %778 = vmatprep.subr.bf16.mxu1 %v804_v32 }
  0x20   : > { %786 = vmatpush3.bf16.msra.mxu1 %v804_v32 }
  0x21   : > { %747 = vmatpush3.bf16.msra.mxu0 %v801_v16  ;;  %779 = vmatprep.subr.bf16.mxu1 %v805_v33 }
  0x22   : > { %748 = vmatprep.subr.bf16.mxu0 %v802_v21 }
  0x24   : > { %733 = vmatmul.mubr.msk.bf16.gmra.mrb[8].mxu0 %vm276_vm0, %v250_v27  ;;  %787 = vmatpush3.bf16.msra.mxu1 %v805_v33  ;;  %v683_v27 = vld [vmem:[%s968_s4] ss:$0 sm:$0xff] }
  0x25   : > { %736 = vmatprep.mubr.msk.bf16.mxu0 %vm276_vm0, %v251_v28  ;;  %749 = vmatpush3.bf16.msra.mxu0 %v802_v21 }
  0x26   : > { %750 = vmatprep.subr.bf16.mxu0 %v803_v24 }
  0x29   : > { %751 = vmatpush3.bf16.msra.mxu0 %v803_v24 }
  0x2a   : > { %752 = vmatprep.subr.bf16.mxu0 %v804_v32 }
  0x2c   : > { %737 = vmatmul.mubr.msk.bf16.gmra.mrb[12].mxu0 %vm276_vm0, %v252_v31 }
  0x2d   : > { %753 = vmatpush3.bf16.msra.mxu0 %v804_v32 }
  0x2e   : > { %754 = vmatprep.subr.bf16.mxu0 %v805_v33 }
  0x31   : > { %755 = vmatpush3.bf16.msra.mxu0 %v805_v33 }
  0xe7   : > { %v726_v35 = vpop.f32.mrb[0].mxu0 }
  0xe8   : > { %v344_v36 = vadd.f32 %v726_v35, %v672_v34  ;;  %v335_v37 = vpop.f32.mrb[1].mxu0 }
  0xe9   : > { %v336_v38 = vadd.f32 %v672_v34, %v335_v37  ;;  %v727_v39 = vpop.f32.mrb[2].mxu0 }
  0xea   : > { %v347_v40 = vadd.f32 %v727_v39, %v672_v34  ;;  %v338_v41 = vpop.f32.mrb[3].mxu0  ;;  %v400_v43 = vmax.f32 %v344_v36, 0.0 }
  0xeb   : > { %v339_v42 = vadd.f32 %v672_v34, %v338_v41  ;;  %v398_v45 = vmax.f32 %v336_v38, 0.0 }
  0xec   : > { %v401_v44 = vmax.f32 %v347_v40, 0.0 }
  0xed   : > { %v399_v46 = vmax.f32 %v339_v42, 0.0 }
  0xee   : > { %v415_v47 = vpack.c.bf16 %v401_v44, %v400_v43 }
  0xef   : > { %v414_v48 = vpack.c.bf16 %v399_v46, %v398_v45  ;;  %v730_v49 = vpop.f32.mrb[4].mxu0 }
  0xf0   : > { %v360_v50 = vadd.f32 %v730_v49, %v672_v34  ;;  %v351_v51 = vpop.f32.mrb[5].mxu0 }
  0xf1   : > { %v352_v52 = vadd.f32 %v672_v34, %v351_v51  ;;  %v731_v53 = vpop.f32.mrb[6].mxu0  ;;  %756 = vmatprep.mubr.bf16.mxu0 %v414_v48 }
  0xf2   : > { %v363_v54 = vadd.f32 %v731_v53, %v672_v34  ;;  %v354_v55 = vpop.f32.mrb[7].mxu0  ;;  %757 = vmatmul.mubr.bf16.vlgmr.msra.gmra.mrb[16].mxu0 %v415_v47  ;;  %v404_v57 = vmax.f32 %v360_v50, 0.0 }
  0xf3   : > { %v355_v56 = vadd.f32 %v672_v34, %v354_v55  ;;  %v402_v59 = vmax.f32 %v352_v52, 0.0 }
  0xf4   : > { %v405_v58 = vmax.f32 %v363_v54, 0.0 }
  0xf5   : > { %v403_v60 = vmax.f32 %v355_v56, 0.0 }
  0xf6   : > { %v417_v61 = vpack.c.bf16 %v405_v58, %v404_v57 }
  0xf7   : > { %v734_v62 = vpop.f32.mrb[8].mxu0  ;;  %v416_v63 = vpack.c.bf16 %v403_v60, %v402_v59 }
  0xf8   : > { %v376_v0 = vadd.f32 %v734_v62, %v672_v34  ;;  %v367_v1 = vpop.f32.mrb[9].mxu0 }
  0xf9   : > { %v368_v2 = vadd.f32 %v672_v34, %v367_v1  ;;  %v735_v3 = vpop.f32.mrb[10].mxu0  ;;  %760 = vmatprep.mubr.bf16.mxu1 %v416_v63 }
  0xfa   : > { %v379_v4 = vadd.f32 %v735_v3, %v672_v34  ;;  %v370_v5 = vpop.f32.mrb[11].mxu0  ;;  %761 = vmatmul.mubr.bf16.vlgmr.msra.gmra.mrb[0].mxu1 %v417_v61  ;;  %v408_v7 = vmax.f32 %v376_v0, 0.0 }
  0xfb   : > { %v371_v6 = vadd.f32 %v672_v34, %v370_v5  ;;  %v406_v9 = vmax.f32 %v368_v2, 0.0 }
  0xfc   : > { %v409_v8 = vmax.f32 %v379_v4, 0.0 }
  0xfd   : > { %v407_v10 = vmax.f32 %v371_v6, 0.0 }
  0xfe   : > { %v419_v11 = vpack.c.bf16 %v409_v8, %v408_v7 }
  0xff   : > { %v418_v12 = vpack.c.bf16 %v407_v10, %v406_v9  ;;  %v738_v13 = vpop.f32.mrb[12].mxu0 }
 0x100   : > { %v392_v14 = vadd.f32 %v738_v13, %v672_v34  ;;  %v383_v15 = vpop.f32.mrb[13].mxu0 }
 0x101   : > { %v384_v16 = vadd.f32 %v672_v34, %v383_v15  ;;  %v739_v17 = vpop.f32.mrb[14].mxu0  ;;  %764 = vmatprep.mubr.bf16.mxu1 %v418_v12 }
 0x102   : > { %v395_v18 = vadd.f32 %v739_v17, %v672_v34  ;;  %v386_v19 = vpop.f32.mrb[15].mxu0  ;;  %765 = vmatmul.mubr.bf16.gmra.mrb[4].mxu1 %v419_v11  ;;  %v412_v21 = vmax.f32 %v392_v14, 0.0 }
 0x103   : > { %v387_v20 = vadd.f32 %v672_v34, %v386_v19  ;;  %v410_v23 = vmax.f32 %v384_v16, 0.0 }
 0x104   : > { %v413_v22 = vmax.f32 %v395_v18, 0.0 }
 0x105   : > { %v411_v24 = vmax.f32 %v387_v20, 0.0 }
 0x106   : > { %v421_v25 = vpack.c.bf16 %v413_v22, %v412_v21 }
 0x107   : > { %v420_v26 = vpack.c.bf16 %v411_v24, %v410_v23 }
 0x109   : > { %768 = vmatprep.mubr.bf16.mxu1 %v420_v26 }
 0x10a   : > { %769 = vmatmul.mubr.bf16.gmra.mrb[8].mxu1 %v421_v25 }
 0x1c5   : > { %v758_v28 = vpop.f32.mrb[16].mxu0 }
 0x1c6   : > { %v536_v29 = vadd.f32 %v758_v28, %v683_v27  ;;  %v527_v30 = vpop.f32.mrb[17].mxu0 }
 0x1c7   : > { %v528_v31 = vadd.f32 %v683_v27, %v527_v30  ;;  %v759_v32 = vpop.f32.mrb[18].mxu0 }
 0x1c8   : > { %593 = vst.msk [vmem:[%s927_s28 + $0x10] sm:$0xff] %vm590_vm1, %v536_v29  ;;  %v539_v33 = vadd.f32 %v759_v32, %v683_v27  ;;  %v530_v34 = vpop.f32.mrb[19].mxu0 }
 0x1c9   : > { %591 = vst.msk [vmem:[%s927_s28] sm:$0xff] %vm590_vm1, %v528_v31  ;;  %v531_v35 = vadd.f32 %v683_v27, %v530_v34 }
 0x1ca   : > { %594 = vst.msk [vmem:[%s927_s28 + $0x18] sm:$0xff] %vm590_vm1, %v539_v33 }
 0x1cb   : > { %592 = vst.msk [vmem:[%s927_s28 + $0x8] sm:$0xff] %vm590_vm1, %v531_v35 }
 0x1cd   : > { %v762_v36 = vpop.f32.mrb[0].mxu1 }
 0x1ce   : > { %v552_v37 = vadd.f32 %v762_v36, %v683_v27  ;;  %v543_v38 = vpop.f32.mrb[1].mxu1 }
 0x1cf   : > { %v544_v39 = vadd.f32 %v683_v27, %v543_v38  ;;  %v763_v40 = vpop.f32.mrb[2].mxu1 }
 0x1d0   : > { %597 = vst.msk [vmem:[%s927_s28 + $0x30] sm:$0xff] %vm590_vm1, %v552_v37  ;;  %v555_v41 = vadd.f32 %v763_v40, %v683_v27  ;;  %v546_v42 = vpop.f32.mrb[3].mxu1 }
 0x1d1   : > { %595 = vst.msk [vmem:[%s927_s28 + $0x20] sm:$0xff] %vm590_vm1, %v544_v39  ;;  %v547_v43 = vadd.f32 %v683_v27, %v546_v42 }
 0x1d2   : > { %598 = vst.msk [vmem:[%s927_s28 + $0x38] sm:$0xff] %vm590_vm1, %v555_v41 }
 0x1d3   : > { %596 = vst.msk [vmem:[%s927_s28 + $0x28] sm:$0xff] %vm590_vm1, %v547_v43 }
 0x1d5   : > { %v766_v44 = vpop.f32.mrb[4].mxu1 }
 0x1d6   : > { %v568_v45 = vadd.f32 %v766_v44, %v683_v27  ;;  %v559_v46 = vpop.f32.mrb[5].mxu1 }
 0x1d7   : > { %v560_v47 = vadd.f32 %v683_v27, %v559_v46  ;;  %v767_v48 = vpop.f32.mrb[6].mxu1 }
 0x1d8   : > { %601 = vst.msk [vmem:[%s927_s28 + $0x50] sm:$0xff] %vm590_vm1, %v568_v45  ;;  %v571_v49 = vadd.f32 %v767_v48, %v683_v27  ;;  %v562_v50 = vpop.f32.mrb[7].mxu1 }
 0x1d9   : > { %599 = vst.msk [vmem:[%s927_s28 + $0x40] sm:$0xff] %vm590_vm1, %v560_v47  ;;  %v563_v51 = vadd.f32 %v683_v27, %v562_v50 }
 0x1da   : > { %602 = vst.msk [vmem:[%s927_s28 + $0x58] sm:$0xff] %vm590_vm1, %v571_v49 }
 0x1db   : > { %600 = vst.msk [vmem:[%s927_s28 + $0x48] sm:$0xff] %vm590_vm1, %v563_v51 }
 0x1dd   : > { %v770_v52 = vpop.f32.mrb[8].mxu1 }
 0x1de   : > { %v584_v53 = vadd.f32 %v770_v52, %v683_v27  ;;  %v575_v54 = vpop.f32.mrb[9].mxu1 }
 0x1df   : > { %v576_v55 = vadd.f32 %v683_v27, %v575_v54  ;;  %v771_v56 = vpop.f32.mrb[10].mxu1 }
 0x1e0   : > { %605 = vst.msk [vmem:[%s927_s28 + $0x70] sm:$0xff] %vm590_vm1, %v584_v53  ;;  %v587_v57 = vadd.f32 %v771_v56, %v683_v27  ;;  %v578_v58 = vpop.f32.mrb[11].mxu1 }
 0x1e1   : > { %603 = vst.msk [vmem:[%s927_s28 + $0x60] sm:$0xff] %vm590_vm1, %v576_v55  ;;  %v579_v59 = vadd.f32 %v683_v27, %v578_v58 }
 0x1e2   : > { %606 = vst.msk [vmem:[%s927_s28 + $0x78] sm:$0xff] %vm590_vm1, %v587_v57 }
 0x1e3   : > { %604 = vst.msk [vmem:[%s927_s28 + $0x68] sm:$0xff] %vm590_vm1, %v579_v59 }
 0x1e4 PF: > { %s15_s18 = sadd.s32 1, %s812_s18  }
 0x1e5   : > { %p12_p4 = scmp.ge.s32.totalorder %s15_s18, 6  }
 0x1e7   :  { %14 = sbr.rel (!%p12_p4) target bundleno = 1 (0x1), region = 70 }

</bundles_post_ra>
